<compile_context>
chip_gen: v7x
topology: tpu7x:2x2x1
jax: 0.10.0
libtpu: 0.0.40
codegen_flags: <defaults>
</compile_context>

<pallas_src>
import numpy as np
import jax
import jax.numpy as jnp
from jax.experimental import pallas as pl
from jax.experimental.pallas import tpu as pltpu


def _round_up(x, m):
    return ((x + m - 1) // m) * m


# ----------------------------- in-kernel math helpers -----------------------------

def _gelu(x):
    # TODO(synk): nn.GELU default is exact erf-GELU; tanh approximation used for robust TPU lowering.
    c = 0.7978845608028654  # sqrt(2/pi)
    return 0.5 * x * (1.0 + jnp.tanh(c * (x + 0.044715 * x * x * x)))


def _ln_gelu_t(h, vec):
    """GELU(LayerNorm(h + bias)) with features on axis 0 (transposed layout), eps=1e-5.

    `vec` is an (H, 3) f32 slab holding [bias | gamma | beta] columns.
    All elementwise / reduction math stays f32."""
    h = h + vec[:, 0:1]
    mu = jnp.mean(h, axis=0, keepdims=True)
    var = jnp.mean(jnp.square(h - mu), axis=0, keepdims=True)
    hn = (h - mu) * jax.lax.rsqrt(var + 1e-5)
    return _gelu(hn * vec[:, 1:2] + vec[:, 2:3])


# ----------------------------- fused kernel -----------------------------

def _make_fused_kernel(meta):
    n_int_cols = meta["n_int_cols"]
    k_onehot = meta["k_onehot_padded"]
    n_net_extra = meta["n_net_extra"]
    header_hidden = meta["header_hidden"]

    def kernel(xint_ref, xf_ref, *rest):
        out_ref = rest[-1]
        it = iter(rest[:-1])

        # ---- VMEM-resident parameters (constant index_map -> fetched once) ----
        w1 = next(it)[...]                                   # (H1, K_total) bf16, W1 pre-folded with emb tables
        v1 = next(it)[...]                                   # (H1, 3) f32 [b|gamma|beta]
        net = [(next(it)[...], next(it)[...]) for _ in range(n_net_extra)]
        headers = []
        for depth in header_hidden:
            hid = [(next(it)[...], next(it)[...]) for _ in range(depth)]
            wo = next(it)[...]                               # (hu, 1) f32
            headers.append((hid, wo))
        bo = next(it)[...]                                   # (n_headers, 1) f32

        # ---- runtime inputs (batch on lanes) ----
        xint = xint_ref[...]                                 # (n_int_cols, bt) int32, offsets pre-added
        xf = xf_ref[...]                                     # (nf_pad, bt) f32: [age weights | num | 0-pad]
        bt = xint.shape[1]

        # ---- layer 1: combined one-hot against ONE iota + a single folded matmul ----
        iota = jax.lax.broadcasted_iota(jnp.int32, (k_onehot, bt), 0)
        oh = (iota == xint[0:1, :]).astype(jnp.float32)
        for j in range(1, n_int_cols):
            oh = oh + (iota == xint[j:j + 1, :]).astype(jnp.float32)
        operand = jnp.concatenate([oh, xf], axis=0).astype(jnp.bfloat16)   # (K_total, bt)
        h = jnp.dot(w1, operand, preferred_element_type=jnp.float32)       # (H1, bt) f32
        h = _ln_gelu_t(h, v1)                                # Dropout is identity in eval mode

        # ---- remaining backbone layers ----
        for (w, v) in net:
            h = _ln_gelu_t(jnp.dot(w, h.astype(jnp.bfloat16),
                                   preferred_element_type=jnp.float32), v)

        # ---- headers: hidden stacks, packed into one lane-dense (n_headers, bt) output ----
        rows = []
        for (hid, wo) in headers:
            z = h
            for (w, v) in hid:
                z = _ln_gelu_t(jnp.dot(w, z.astype(jnp.bfloat16),
                                       preferred_element_type=jnp.float32), v)
            rows.append(jnp.sum(z * wo, axis=0, keepdims=True))   # (1, bt): VPU mul + sublane reduce
        out_ref[...] = jnp.concatenate(rows, axis=0) + bo

    return kernel


# ----------------------------- parameter init (matches torch defaults) -----------------------------

def init_linear(key, fan_in, fan_out):
    kw, kb = jax.random.split(key)
    bound = 1.0 / (fan_in ** 0.5)
    w = jax.random.uniform(kw, (fan_in, fan_out), minval=-bound, maxval=bound, dtype=jnp.float32)
    b = jax.random.uniform(kb, (fan_out,), minval=-bound, maxval=bound, dtype=jnp.float32)
    return w, b


def init_layernorm(n):
    return jnp.ones((n,), jnp.float32), jnp.zeros((n,), jnp.float32)


def init_backbone_params(key, cfg):
    params = {"emb": {}, "net": [], "headers": {}}
    for name, card in cfg["categorical_cardinality"].items():
        key, k = jax.random.split(key)
        params["emb"][name] = jax.random.normal(
            k, (card, cfg["categorical_embedding_dim"]), dtype=jnp.float32)

    cat_dim = len(cfg["categorical_cols"]) * cfg["categorical_embedding_dim"]
    share_dim = sum(len(v) * cfg["categorical_embedding_dim"]
                    for v in cfg["share_categorical_group"].values())
    concat_dim = cat_dim + share_dim + cfg["categorical_embedding_dim"] + cfg["numerical_dim"]

    units = [concat_dim] + cfg["network_units"]
    for i in range(len(units) - 1):
        key, k = jax.random.split(key)
        w, b = init_linear(k, units[i], units[i + 1])
        g, beta = init_layernorm(units[i + 1])
        params["net"].append((w, b, g, beta))

    header_in = cfg["network_units"][-1]
    for hname, hunits in cfg["header_units"].items():
        hu = [header_in] + hunits
        layers = []
        for i in range(len(hu) - 1):
            key, k = jax.random.split(key)
            w, b = init_linear(k, hu[i], hu[i + 1])
            g, beta = init_layernorm(hu[i + 1])
            layers.append((w, b, g, beta))
        key, k = jax.random.split(key)
        wo, bo = init_linear(k, hu[-1], 1)
        params["headers"][hname] = (layers, (wo, bo))
    return params


# ----------------------------- fused-kernel parameter packing -----------------------------

def prepare_fused(params, cfg):
    """Pre-fold every embedding table through its W1 row block (so layer 1 is one matmul)
    and pack all parameters into a handful of transposed slabs for the [features, batch]
    in-kernel layout. Also emits per-integer-column one-hot offsets."""
    d = cfg["categorical_embedding_dim"]
    cat_cols = cfg["categorical_cols"]
    share_groups = list(cfg["share_categorical_group"].keys())
    share_ncols = [len(cfg["share_categorical_group"][g]) for g in share_groups]
    num_dim = cfg["numerical_dim"]
    num_cluster = cfg["categorical_cardinality"]["age_cluster"]
    header_names = list(cfg["header_units"].keys())

    w1, b1, g1, be1 = params["net"][0]
    H1 = w1.shape[1]

    # split W1 rows following the torch concat order [cat cols..., age, num, share cols...]
    off = 0
    w1_cat = []
    for _ in cat_cols:
        w1_cat.append(w1[off:off + d]); off += d
    w1_age = w1[off:off + d]; off += d
    w1_num = w1[off:off + num_dim]; off += num_dim
    w1_share = []
    for nc in share_ncols:
        cols = []
        for _ in range(nc):
            cols.append(w1[off:off + d]); off += d
        w1_share.append(cols)
    assert off == w1.shape[0]

    # fold embedding tables through W1: one-hot section first, then [age | num]
    folded, col_offsets, k = [], [], 0
    for name, wc in zip(cat_cols, w1_cat):
        E = params["emb"][name]
        folded.append((E @ wc).T)                       # (H1, card)
        col_offsets.append(k); k += E.shape[0]
    for gname, cols in zip(share_groups, w1_share):
        E = params["emb"][gname]                        # shared table, one W1 block per column
        for wc in cols:
            folded.append((E @ wc).T)
            col_offsets.append(k); k += E.shape[0]
    k_onehot_pad = _round_up(k, 8)                      # sublane-align the one-hot|float boundary
    if k_onehot_pad > k:
        folded.append(jnp.zeros((H1, k_onehot_pad - k), jnp.float32))
    nf = num_cluster + num_dim
    nf_pad = _round_up(nf, 8)
    folded.append((params["emb"]["age_cluster"] @ w1_age).T)   # age weighted-sum == weights @ E_age
    folded.append(w1_num.T)
    if nf_pad > nf:
        folded.append(jnp.zeros((H1, nf_pad - nf), jnp.float32))
    w1_slab = jnp.concatenate(folded, axis=1)           # (H1, k_onehot_pad + nf_pad)

    def vec_slab(b, g, be):                             # (H, 3) f32: [bias | gamma | beta]
        return jnp.stack([b, g, be], axis=1).astype(jnp.float32)

    flat = [w1_slab.astype(jnp.bfloat16), vec_slab(b1, g1, be1)]
    for (w, b, g, be) in params["net"][1:]:
        flat += [w.T.astype(jnp.bfloat16), vec_slab(b, g, be)]

    header_hidden, bo_all = [], []
    for name in header_names:
        layers, (wo, bo) = params["headers"][name]
        header_hidden.append(len(layers))
        for (w, b, g, be) in layers:
            flat += [w.T.astype(jnp.bfloat16), vec_slab(b, g, be)]
        flat += [wo.astype(jnp.float32)]                # (hu, 1), applied on the VPU (no M=1 matmul)
        bo_all.append(bo)
    flat += [jnp.stack(bo_all, axis=0).astype(jnp.float32)]    # (n_headers, 1)

    meta = {
        "share_groups": share_groups,
        "header_names": header_names,
        "header_hidden": header_hidden,
        "n_net_extra": len(params["net"]) - 1,
        "n_int_cols": len(cat_cols) + sum(share_ncols),
        "k_onehot_padded": k_onehot_pad,
        "nf_pad": nf_pad,
        "col_offsets": np.asarray(col_offsets, np.int32).reshape(1, -1),
    }
    return tuple(flat), meta


# ----------------------------- fused forward (one pallas_call) -----------------------------

def _choose_batch_tile(B):
    # Big tiles amortize the ~0.35us/step grid overhead; keep >=2 steps when possible so
    # dimension_semantics=("parallel",) can shard across v7x's two TensorCores.
    for t in (2048, 1024, 512, 256, 128):
        if B >= 2 * t:
            return t
    return 128


def backbone_forward_fused(flat_params, meta, X_cat, X_share_cat, X_age_weight, X_num):
    B = X_cat.shape[0]
    bt = _choose_batch_tile(B)
    B_pad = _round_up(B, bt)
    n_headers = len(meta["header_names"])
    nf_pad = meta["nf_pad"]

    # Pack integer columns (+ per-column one-hot offsets) and float features; pad the batch
    # to a tile multiple; transpose so the batch dimension maps to TPU lanes.
    X_int = jnp.concatenate(
        [X_cat.astype(jnp.int32)]
        + [X_share_cat[g].astype(jnp.int32) for g in meta["share_groups"]], axis=1)
    X_int = X_int + jnp.asarray(meta["col_offsets"])
    Xf = jnp.concatenate([X_age_weight.astype(jnp.float32),
                          X_num.astype(jnp.float32)], axis=1)
    Xf = jnp.pad(Xf, ((0, 0), (0, nf_pad - Xf.shape[1])))
    if B_pad != B:
        X_int = jnp.pad(X_int, ((0, B_pad - B), (0, 0)))
        Xf = jnp.pad(Xf, ((0, B_pad - B), (0, 0)))
    X_int_t = X_int.T            # (n_int_cols, B_pad)
    Xf_t = Xf.T                  # (nf_pad, B_pad)

    grid = (B_pad // bt,)

    def batch_spec(rows):        # tiled along batch (lane axis)
        return pl.BlockSpec((rows, bt), lambda i: (0, i))

    def resident_spec(shape):    # same block every grid step -> stays VMEM-resident
        return pl.BlockSpec(shape, lambda i: (0, 0))

    out = pl.pallas_call(
        _make_fused_kernel(meta),
        out_shape=jax.ShapeDtypeStruct((n_headers, B_pad), jnp.float32),
        grid=grid,
        in_specs=[batch_spec(X_int_t.shape[0]), batch_spec(Xf_t.shape[0])]
                 + [resident_spec(p.shape) for p in flat_params],
        out_specs=pl.BlockSpec((n_headers, bt), lambda i: (0, i)),
        compiler_params=pltpu.CompilerParams(
            dimension_semantics=("parallel",),
            vmem_limit_bytes=32 * 1024 * 1024),
    )(X_int_t, Xf_t, *flat_params)

    return {name: out[i, :B].reshape(B, 1) for i, name in enumerate(meta["header_names"])}


# ----------------------------- Main -----------------------------

if __name__ == "__main__":
    cfg = {
        "numerical_dim": 6,
        "categorical_embedding_dim": 4,
        "categorical_cols": ["c1", "c2", "c3"],
        "categorical_cardinality": {"c1": 10, "c2": 7, "c3": 5, "g1": 12, "age_cluster": 6},
        "share_categorical_group": {"g1": ["s1", "s2"]},
        "network_units": [32, 16],
        "header_units": {"ctr": [8], "cvr": [8]},
        "dropout": 0.1,   # identity at inference
        "norm": "layer",
    }
    B = 8
    num_cluster = cfg["categorical_cardinality"]["age_cluster"]

    root = jax.random.PRNGKey(0)
    kp, k1, k2, k3, k4 = jax.random.split(root, 5)

    params = init_backbone_params(kp, cfg)
    flat_params, meta = prepare_fused(params, cfg)

    X_cat = jnp.stack(
        [jax.random.randint(jax.random.fold_in(k1, i), (B,), 0,
                            cfg["categorical_cardinality"][name])
         for i, name in enumerate(cfg["categorical_cols"])], axis=1).astype(jnp.int32)
    X_share_cat = {
        "g1": jax.random.randint(k2, (B, len(cfg["share_categorical_group"]["g1"])),
                                 0, cfg["categorical_cardinality"]["g1"]).astype(jnp.int32)
    }
    X_age_weight = jax.nn.softmax(
        jax.random.normal(k3, (B, num_cluster), dtype=jnp.float32), axis=-1)
    X_num = jax.random.normal(k4, (B, cfg["numerical_dim"]), dtype=jnp.float32)

    fwd = jax.jit(lambda fp, xc, xs, xa, xn: backbone_forward_fused(fp, meta, xc, xs, xa, xn))
    Y = fwd(flat_params, X_cat, X_share_cat, X_age_weight, X_num)
    Y = jax.block_until_ready(Y)

    assert set(Y.keys()) == set(cfg["header_units"].keys())
    for name, y in Y.items():
        assert y.shape == (B, 1), (name, y.shape)
        assert bool(jnp.all(jnp.isfinite(y)))
    print("KERNEL_OK")
</pallas_src>

<mosaic_0001>
module attributes {stable_mosaic.version = 11 : i64} {
  func.func @kernel(%arg0: i32, %arg1: memref<5x128xi32, #tpu.memory_space<vmem>>, %arg2: memref<16x128xf32, #tpu.memory_space<vmem>>, %arg3: memref<32x64xbf16, #tpu.memory_space<vmem>>, %arg4: memref<32x3xf32, #tpu.memory_space<vmem>>, %arg5: memref<16x32xbf16, #tpu.memory_space<vmem>>, %arg6: memref<16x3xf32, #tpu.memory_space<vmem>>, %arg7: memref<8x16xbf16, #tpu.memory_space<vmem>>, %arg8: memref<8x3xf32, #tpu.memory_space<vmem>>, %arg9: memref<8x1xf32, #tpu.memory_space<vmem>>, %arg10: memref<8x16xbf16, #tpu.memory_space<vmem>>, %arg11: memref<8x3xf32, #tpu.memory_space<vmem>>, %arg12: memref<8x1xf32, #tpu.memory_space<vmem>>, %arg13: memref<2x1xf32, #tpu.memory_space<vmem>>, %arg14: memref<2x128xf32, #tpu.memory_space<vmem>>) attributes {dimension_semantics = [#tpu.dimension_semantics<parallel>], iteration_bounds = array<i64: 1>, scalar_prefetch = 0 : i64, scratch_operands = 0 : i64, tpu.core_type = #tpu.core_type<tc>, window_params = [{transform_indices = @transform_0, window_bounds = array<i64: 5, 128>}, {transform_indices = @transform_1, window_bounds = array<i64: 16, 128>}, {pipeline_mode = #tpu.pipeline_mode<synchronous>, transform_indices = @transform_2, window_bounds = array<i64: 32, 64>}, {pipeline_mode = #tpu.pipeline_mode<synchronous>, transform_indices = @transform_3, window_bounds = array<i64: 32, 3>}, {pipeline_mode = #tpu.pipeline_mode<synchronous>, transform_indices = @transform_4, window_bounds = array<i64: 16, 32>}, {pipeline_mode = #tpu.pipeline_mode<synchronous>, transform_indices = @transform_5, window_bounds = array<i64: 16, 3>}, {pipeline_mode = #tpu.pipeline_mode<synchronous>, transform_indices = @transform_6, window_bounds = array<i64: 8, 16>}, {pipeline_mode = #tpu.pipeline_mode<synchronous>, transform_indices = @transform_7, window_bounds = array<i64: 8, 3>}, {pipeline_mode = #tpu.pipeline_mode<synchronous>, transform_indices = @transform_8, window_bounds = array<i64: 8, 1>}, {pipeline_mode = #tpu.pipeline_mode<synchronous>, transform_indices = @transform_9, window_bounds = array<i64: 8, 16>}, {pipeline_mode = #tpu.pipeline_mode<synchronous>, transform_indices = @transform_10, window_bounds = array<i64: 8, 3>}, {pipeline_mode = #tpu.pipeline_mode<synchronous>, transform_indices = @transform_11, window_bounds = array<i64: 8, 1>}, {pipeline_mode = #tpu.pipeline_mode<synchronous>, transform_indices = @transform_12, window_bounds = array<i64: 2, 1>}, {transform_indices = @transform_13, window_bounds = array<i64: 2, 128>}]} {
    %c0 = arith.constant 0 : index
    %c0_0 = arith.constant 0 : index
    %0 = vector.load %arg3[%c0, %c0_0] : memref<32x64xbf16, #tpu.memory_space<vmem>>, vector<32x64xbf16>
    %c0_1 = arith.constant 0 : index
    %c0_2 = arith.constant 0 : index
    %1 = vector.load %arg4[%c0_1, %c0_2] : memref<32x3xf32, #tpu.memory_space<vmem>>, vector<32x3xf32>
    %c0_3 = arith.constant 0 : index
    %c0_4 = arith.constant 0 : index
    %2 = vector.load %arg5[%c0_3, %c0_4] : memref<16x32xbf16, #tpu.memory_space<vmem>>, vector<16x32xbf16>
    %c0_5 = arith.constant 0 : index
    %c0_6 = arith.constant 0 : index
    %3 = vector.load %arg6[%c0_5, %c0_6] : memref<16x3xf32, #tpu.memory_space<vmem>>, vector<16x3xf32>
    %c0_7 = arith.constant 0 : index
    %c0_8 = arith.constant 0 : index
    %4 = vector.load %arg7[%c0_7, %c0_8] : memref<8x16xbf16, #tpu.memory_space<vmem>>, vector<8x16xbf16>
    %c0_9 = arith.constant 0 : index
    %c0_10 = arith.constant 0 : index
    %5 = vector.load %arg8[%c0_9, %c0_10] : memref<8x3xf32, #tpu.memory_space<vmem>>, vector<8x3xf32>
    %c0_11 = arith.constant 0 : index
    %c0_12 = arith.constant 0 : index
    %6 = vector.load %arg9[%c0_11, %c0_12] : memref<8x1xf32, #tpu.memory_space<vmem>>, vector<8x1xf32>
    %c0_13 = arith.constant 0 : index
    %c0_14 = arith.constant 0 : index
    %7 = vector.load %arg10[%c0_13, %c0_14] : memref<8x16xbf16, #tpu.memory_space<vmem>>, vector<8x16xbf16>
    %c0_15 = arith.constant 0 : index
    %c0_16 = arith.constant 0 : index
    %8 = vector.load %arg11[%c0_15, %c0_16] : memref<8x3xf32, #tpu.memory_space<vmem>>, vector<8x3xf32>
    %c0_17 = arith.constant 0 : index
    %c0_18 = arith.constant 0 : index
    %9 = vector.load %arg12[%c0_17, %c0_18] : memref<8x1xf32, #tpu.memory_space<vmem>>, vector<8x1xf32>
    %c0_19 = arith.constant 0 : index
    %c0_20 = arith.constant 0 : index
    %10 = vector.load %arg13[%c0_19, %c0_20] : memref<2x1xf32, #tpu.memory_space<vmem>>, vector<2x1xf32>
    %c0_21 = arith.constant 0 : index
    %c0_22 = arith.constant 0 : index
    %11 = vector.load %arg1[%c0_21, %c0_22] : memref<5x128xi32, #tpu.memory_space<vmem>>, vector<5x128xi32>
    %c0_23 = arith.constant 0 : index
    %c0_24 = arith.constant 0 : index
    %12 = vector.load %arg2[%c0_23, %c0_24] : memref<16x128xf32, #tpu.memory_space<vmem>>, vector<16x128xf32>
    %13 = tpu.iota {dimensions = array<i32: 0>} : vector<48x128xi32>
    %14 = vector.extract_strided_slice %11 {offsets = [0, 0], sizes = [1, 128], strides = [1, 1]} : vector<5x128xi32> to vector<1x128xi32>
    %15 = vector.broadcast %14 : vector<1x128xi32> to vector<48x128xi32>
    %16 = arith.cmpi eq, %13, %15 : vector<48x128xi32>
    %17 = arith.extui %16 : vector<48x128xi1> to vector<48x128xi32>
    %18 = arith.sitofp %17 : vector<48x128xi32> to vector<48x128xf32>
    %19 = vector.extract_strided_slice %11 {offsets = [1, 0], sizes = [1, 128], strides = [1, 1]} : vector<5x128xi32> to vector<1x128xi32>
    %20 = vector.broadcast %19 : vector<1x128xi32> to vector<48x128xi32>
    %21 = arith.cmpi eq, %13, %20 : vector<48x128xi32>
    %22 = arith.extui %21 : vector<48x128xi1> to vector<48x128xi32>
    %23 = arith.sitofp %22 : vector<48x128xi32> to vector<48x128xf32>
    %24 = arith.addf %18, %23 : vector<48x128xf32>
    %25 = vector.extract_strided_slice %11 {offsets = [2, 0], sizes = [1, 128], strides = [1, 1]} : vector<5x128xi32> to vector<1x128xi32>
    %26 = vector.broadcast %25 : vector<1x128xi32> to vector<48x128xi32>
    %27 = arith.cmpi eq, %13, %26 : vector<48x128xi32>
    %28 = arith.extui %27 : vector<48x128xi1> to vector<48x128xi32>
    %29 = arith.sitofp %28 : vector<48x128xi32> to vector<48x128xf32>
    %30 = arith.addf %24, %29 : vector<48x128xf32>
    %31 = vector.extract_strided_slice %11 {offsets = [3, 0], sizes = [1, 128], strides = [1, 1]} : vector<5x128xi32> to vector<1x128xi32>
    %32 = vector.broadcast %31 : vector<1x128xi32> to vector<48x128xi32>
    %33 = arith.cmpi eq, %13, %32 : vector<48x128xi32>
    %34 = arith.extui %33 : vector<48x128xi1> to vector<48x128xi32>
    %35 = arith.sitofp %34 : vector<48x128xi32> to vector<48x128xf32>
    %36 = arith.addf %30, %35 : vector<48x128xf32>
    %37 = vector.extract_strided_slice %11 {offsets = [4, 0], sizes = [1, 128], strides = [1, 1]} : vector<5x128xi32> to vector<1x128xi32>
    %38 = vector.broadcast %37 : vector<1x128xi32> to vector<48x128xi32>
    %39 = arith.cmpi eq, %13, %38 : vector<48x128xi32>
    %40 = arith.extui %39 : vector<48x128xi1> to vector<48x128xi32>
    %41 = arith.sitofp %40 : vector<48x128xi32> to vector<48x128xf32>
    %42 = arith.addf %36, %41 : vector<48x128xf32>
    %43 = tpu.concatenate %42, %12 in 0 : vector<48x128xf32>, vector<16x128xf32> -> vector<64x128xf32>
    %44 = arith.truncf %43 : vector<64x128xf32> to vector<64x128xbf16>
    %cst = arith.constant dense<0.000000e+00> : vector<32x128xf32>
    %45 = tpu.matmul %0, %44, %cst {dimension_numbers = #tpu.dot_dimension_numbers<[1], [0], [0], [1], [0, 0, 1, 1], [], []>} : vector<32x64xbf16>, vector<64x128xbf16>, vector<32x128xf32> -> vector<32x128xf32>
    %46 = vector.extract_strided_slice %1 {offsets = [0, 0], sizes = [32, 1], strides = [1, 1]} : vector<32x3xf32> to vector<32x1xf32>
    %47 = vector.broadcast %46 : vector<32x1xf32> to vector<32x128xf32>
    %48 = arith.addf %45, %47 : vector<32x128xf32>
    %cst_25 = arith.constant dense<0.000000e+00> : vector<128xf32>
    %49 = vector.multi_reduction <add>, %48, %cst_25 [0] : vector<32x128xf32> to vector<128xf32>
    %50 = vector.shape_cast %49 : vector<128xf32> to vector<1x128xf32>
    %cst_26 = arith.constant 3.200000e+01 : f32
    %51 = vector.broadcast %cst_26 : f32 to vector<1x128xf32>
    %52 = arith.divf %50, %51 : vector<1x128xf32>
    %53 = vector.broadcast %52 : vector<1x128xf32> to vector<32x128xf32>
    %54 = arith.subf %48, %53 : vector<32x128xf32>
    %55 = arith.mulf %54, %54 : vector<32x128xf32>
    %cst_27 = arith.constant dense<0.000000e+00> : vector<128xf32>
    %56 = vector.multi_reduction <add>, %55, %cst_27 [0] : vector<32x128xf32> to vector<128xf32>
    %57 = vector.shape_cast %56 : vector<128xf32> to vector<1x128xf32>
    %cst_28 = arith.constant 3.200000e+01 : f32
    %58 = vector.broadcast %cst_28 : f32 to vector<1x128xf32>
    %59 = arith.divf %57, %58 : vector<1x128xf32>
    %60 = vector.broadcast %52 : vector<1x128xf32> to vector<32x128xf32>
    %61 = arith.subf %48, %60 : vector<32x128xf32>
    %cst_29 = arith.constant 9.99999974E-6 : f32
    %62 = vector.broadcast %cst_29 : f32 to vector<1x128xf32>
    %63 = arith.addf %59, %62 : vector<1x128xf32>
    %64 = math.rsqrt %63 : vector<1x128xf32>
    %65 = vector.broadcast %64 : vector<1x128xf32> to vector<32x128xf32>
    %66 = arith.mulf %61, %65 : vector<32x128xf32>
    %67 = vector.extract_strided_slice %1 {offsets = [0, 1], sizes = [32, 1], strides = [1, 1]} : vector<32x3xf32> to vector<32x1xf32>
    %68 = vector.broadcast %67 : vector<32x1xf32> to vector<32x128xf32>
    %69 = arith.mulf %66, %68 : vector<32x128xf32>
    %70 = vector.extract_strided_slice %1 {offsets = [0, 2], sizes = [32, 1], strides = [1, 1]} : vector<32x3xf32> to vector<32x1xf32>
    %71 = vector.broadcast %70 : vector<32x1xf32> to vector<32x128xf32>
    %72 = arith.addf %69, %71 : vector<32x128xf32>
    %cst_30 = arith.constant 5.000000e-01 : f32
    %73 = vector.broadcast %cst_30 : f32 to vector<32x128xf32>
    %74 = arith.mulf %73, %72 : vector<32x128xf32>
    %cst_31 = arith.constant 4.471500e-02 : f32
    %75 = vector.broadcast %cst_31 : f32 to vector<32x128xf32>
    %76 = arith.mulf %75, %72 : vector<32x128xf32>
    %77 = arith.mulf %76, %72 : vector<32x128xf32>
    %78 = arith.mulf %77, %72 : vector<32x128xf32>
    %79 = arith.addf %72, %78 : vector<32x128xf32>
    %cst_32 = arith.constant 0.797884583 : f32
    %80 = vector.broadcast %cst_32 : f32 to vector<32x128xf32>
    %81 = arith.mulf %80, %79 : vector<32x128xf32>
    %82 = math.tanh %81 : vector<32x128xf32>
    %cst_33 = arith.constant 1.000000e+00 : f32
    %83 = vector.broadcast %cst_33 : f32 to vector<32x128xf32>
    %84 = arith.addf %83, %82 : vector<32x128xf32>
    %85 = arith.mulf %74, %84 : vector<32x128xf32>
    %86 = arith.truncf %85 : vector<32x128xf32> to vector<32x128xbf16>
    %cst_34 = arith.constant dense<0.000000e+00> : vector<16x128xf32>
    %87 = tpu.matmul %2, %86, %cst_34 {dimension_numbers = #tpu.dot_dimension_numbers<[1], [0], [0], [1], [0, 0, 1, 1], [], []>} : vector<16x32xbf16>, vector<32x128xbf16>, vector<16x128xf32> -> vector<16x128xf32>
    %88 = vector.extract_strided_slice %3 {offsets = [0, 0], sizes = [16, 1], strides = [1, 1]} : vector<16x3xf32> to vector<16x1xf32>
    %89 = vector.broadcast %88 : vector<16x1xf32> to vector<16x128xf32>
    %90 = arith.addf %87, %89 : vector<16x128xf32>
    %cst_35 = arith.constant dense<0.000000e+00> : vector<128xf32>
    %91 = vector.multi_reduction <add>, %90, %cst_35 [0] : vector<16x128xf32> to vector<128xf32>
    %92 = vector.shape_cast %91 : vector<128xf32> to vector<1x128xf32>
    %cst_36 = arith.constant 1.600000e+01 : f32
    %93 = vector.broadcast %cst_36 : f32 to vector<1x128xf32>
    %94 = arith.divf %92, %93 : vector<1x128xf32>
    %95 = vector.broadcast %94 : vector<1x128xf32> to vector<16x128xf32>
    %96 = arith.subf %90, %95 : vector<16x128xf32>
    %97 = arith.mulf %96, %96 : vector<16x128xf32>
    %cst_37 = arith.constant dense<0.000000e+00> : vector<128xf32>
    %98 = vector.multi_reduction <add>, %97, %cst_37 [0] : vector<16x128xf32> to vector<128xf32>
    %99 = vector.shape_cast %98 : vector<128xf32> to vector<1x128xf32>
    %cst_38 = arith.constant 1.600000e+01 : f32
    %100 = vector.broadcast %cst_38 : f32 to vector<1x128xf32>
    %101 = arith.divf %99, %100 : vector<1x128xf32>
    %102 = vector.broadcast %94 : vector<1x128xf32> to vector<16x128xf32>
    %103 = arith.subf %90, %102 : vector<16x128xf32>
    %cst_39 = arith.constant 9.99999974E-6 : f32
    %104 = vector.broadcast %cst_39 : f32 to vector<1x128xf32>
    %105 = arith.addf %101, %104 : vector<1x128xf32>
    %106 = math.rsqrt %105 : vector<1x128xf32>
    %107 = vector.broadcast %106 : vector<1x128xf32> to vector<16x128xf32>
    %108 = arith.mulf %103, %107 : vector<16x128xf32>
    %109 = vector.extract_strided_slice %3 {offsets = [0, 1], sizes = [16, 1], strides = [1, 1]} : vector<16x3xf32> to vector<16x1xf32>
    %110 = vector.broadcast %109 : vector<16x1xf32> to vector<16x128xf32>
    %111 = arith.mulf %108, %110 : vector<16x128xf32>
    %112 = vector.extract_strided_slice %3 {offsets = [0, 2], sizes = [16, 1], strides = [1, 1]} : vector<16x3xf32> to vector<16x1xf32>
    %113 = vector.broadcast %112 : vector<16x1xf32> to vector<16x128xf32>
    %114 = arith.addf %111, %113 : vector<16x128xf32>
    %cst_40 = arith.constant 5.000000e-01 : f32
    %115 = vector.broadcast %cst_40 : f32 to vector<16x128xf32>
    %116 = arith.mulf %115, %114 : vector<16x128xf32>
    %cst_41 = arith.constant 4.471500e-02 : f32
    %117 = vector.broadcast %cst_41 : f32 to vector<16x128xf32>
    %118 = arith.mulf %117, %114 : vector<16x128xf32>
    %119 = arith.mulf %118, %114 : vector<16x128xf32>
    %120 = arith.mulf %119, %114 : vector<16x128xf32>
    %121 = arith.addf %114, %120 : vector<16x128xf32>
    %cst_42 = arith.constant 0.797884583 : f32
    %122 = vector.broadcast %cst_42 : f32 to vector<16x128xf32>
    %123 = arith.mulf %122, %121 : vector<16x128xf32>
    %124 = math.tanh %123 : vector<16x128xf32>
    %cst_43 = arith.constant 1.000000e+00 : f32
    %125 = vector.broadcast %cst_43 : f32 to vector<16x128xf32>
    %126 = arith.addf %125, %124 : vector<16x128xf32>
    %127 = arith.mulf %116, %126 : vector<16x128xf32>
    %128 = arith.truncf %127 : vector<16x128xf32> to vector<16x128xbf16>
    %cst_44 = arith.constant dense<0.000000e+00> : vector<8x128xf32>
    %129 = tpu.matmul %4, %128, %cst_44 {dimension_numbers = #tpu.dot_dimension_numbers<[1], [0], [0], [1], [0, 0, 1, 1], [], []>} : vector<8x16xbf16>, vector<16x128xbf16>, vector<8x128xf32> -> vector<8x128xf32>
    %130 = vector.extract_strided_slice %5 {offsets = [0, 0], sizes = [8, 1], strides = [1, 1]} : vector<8x3xf32> to vector<8x1xf32>
    %131 = vector.broadcast %130 : vector<8x1xf32> to vector<8x128xf32>
    %132 = arith.addf %129, %131 : vector<8x128xf32>
    %cst_45 = arith.constant dense<0.000000e+00> : vector<128xf32>
    %133 = vector.multi_reduction <add>, %132, %cst_45 [0] : vector<8x128xf32> to vector<128xf32>
    %134 = vector.shape_cast %133 : vector<128xf32> to vector<1x128xf32>
    %cst_46 = arith.constant 8.000000e+00 : f32
    %135 = vector.broadcast %cst_46 : f32 to vector<1x128xf32>
    %136 = arith.divf %134, %135 : vector<1x128xf32>
    %137 = vector.broadcast %136 : vector<1x128xf32> to vector<8x128xf32>
    %138 = arith.subf %132, %137 : vector<8x128xf32>
    %139 = arith.mulf %138, %138 : vector<8x128xf32>
    %cst_47 = arith.constant dense<0.000000e+00> : vector<128xf32>
    %140 = vector.multi_reduction <add>, %139, %cst_47 [0] : vector<8x128xf32> to vector<128xf32>
    %141 = vector.shape_cast %140 : vector<128xf32> to vector<1x128xf32>
    %cst_48 = arith.constant 8.000000e+00 : f32
    %142 = vector.broadcast %cst_48 : f32 to vector<1x128xf32>
    %143 = arith.divf %141, %142 : vector<1x128xf32>
    %144 = vector.broadcast %136 : vector<1x128xf32> to vector<8x128xf32>
    %145 = arith.subf %132, %144 : vector<8x128xf32>
    %cst_49 = arith.constant 9.99999974E-6 : f32
    %146 = vector.broadcast %cst_49 : f32 to vector<1x128xf32>
    %147 = arith.addf %143, %146 : vector<1x128xf32>
    %148 = math.rsqrt %147 : vector<1x128xf32>
    %149 = vector.broadcast %148 : vector<1x128xf32> to vector<8x128xf32>
    %150 = arith.mulf %145, %149 : vector<8x128xf32>
    %151 = vector.extract_strided_slice %5 {offsets = [0, 1], sizes = [8, 1], strides = [1, 1]} : vector<8x3xf32> to vector<8x1xf32>
    %152 = vector.broadcast %151 : vector<8x1xf32> to vector<8x128xf32>
    %153 = arith.mulf %150, %152 : vector<8x128xf32>
    %154 = vector.extract_strided_slice %5 {offsets = [0, 2], sizes = [8, 1], strides = [1, 1]} : vector<8x3xf32> to vector<8x1xf32>
    %155 = vector.broadcast %154 : vector<8x1xf32> to vector<8x128xf32>
    %156 = arith.addf %153, %155 : vector<8x128xf32>
    %cst_50 = arith.constant 5.000000e-01 : f32
    %157 = vector.broadcast %cst_50 : f32 to vector<8x128xf32>
    %158 = arith.mulf %157, %156 : vector<8x128xf32>
    %cst_51 = arith.constant 4.471500e-02 : f32
    %159 = vector.broadcast %cst_51 : f32 to vector<8x128xf32>
    %160 = arith.mulf %159, %156 : vector<8x128xf32>
    %161 = arith.mulf %160, %156 : vector<8x128xf32>
    %162 = arith.mulf %161, %156 : vector<8x128xf32>
    %163 = arith.addf %156, %162 : vector<8x128xf32>
    %cst_52 = arith.constant 0.797884583 : f32
    %164 = vector.broadcast %cst_52 : f32 to vector<8x128xf32>
    %165 = arith.mulf %164, %163 : vector<8x128xf32>
    %166 = math.tanh %165 : vector<8x128xf32>
    %cst_53 = arith.constant 1.000000e+00 : f32
    %167 = vector.broadcast %cst_53 : f32 to vector<8x128xf32>
    %168 = arith.addf %167, %166 : vector<8x128xf32>
    %169 = arith.mulf %158, %168 : vector<8x128xf32>
    %170 = vector.broadcast %6 : vector<8x1xf32> to vector<8x128xf32>
    %171 = arith.mulf %169, %170 : vector<8x128xf32>
    %cst_54 = arith.constant dense<0.000000e+00> : vector<128xf32>
    %172 = vector.multi_reduction <add>, %171, %cst_54 [0] : vector<8x128xf32> to vector<128xf32>
    %173 = vector.shape_cast %172 : vector<128xf32> to vector<1x128xf32>
    %174 = arith.truncf %127 : vector<16x128xf32> to vector<16x128xbf16>
    %cst_55 = arith.constant dense<0.000000e+00> : vector<8x128xf32>
    %175 = tpu.matmul %7, %174, %cst_55 {dimension_numbers = #tpu.dot_dimension_numbers<[1], [0], [0], [1], [0, 0, 1, 1], [], []>} : vector<8x16xbf16>, vector<16x128xbf16>, vector<8x128xf32> -> vector<8x128xf32>
    %176 = vector.extract_strided_slice %8 {offsets = [0, 0], sizes = [8, 1], strides = [1, 1]} : vector<8x3xf32> to vector<8x1xf32>
    %177 = vector.broadcast %176 : vector<8x1xf32> to vector<8x128xf32>
    %178 = arith.addf %175, %177 : vector<8x128xf32>
    %cst_56 = arith.constant dense<0.000000e+00> : vector<128xf32>
    %179 = vector.multi_reduction <add>, %178, %cst_56 [0] : vector<8x128xf32> to vector<128xf32>
    %180 = vector.shape_cast %179 : vector<128xf32> to vector<1x128xf32>
    %cst_57 = arith.constant 8.000000e+00 : f32
    %181 = vector.broadcast %cst_57 : f32 to vector<1x128xf32>
    %182 = arith.divf %180, %181 : vector<1x128xf32>
    %183 = vector.broadcast %182 : vector<1x128xf32> to vector<8x128xf32>
    %184 = arith.subf %178, %183 : vector<8x128xf32>
    %185 = arith.mulf %184, %184 : vector<8x128xf32>
    %cst_58 = arith.constant dense<0.000000e+00> : vector<128xf32>
    %186 = vector.multi_reduction <add>, %185, %cst_58 [0] : vector<8x128xf32> to vector<128xf32>
    %187 = vector.shape_cast %186 : vector<128xf32> to vector<1x128xf32>
    %cst_59 = arith.constant 8.000000e+00 : f32
    %188 = vector.broadcast %cst_59 : f32 to vector<1x128xf32>
    %189 = arith.divf %187, %188 : vector<1x128xf32>
    %190 = vector.broadcast %182 : vector<1x128xf32> to vector<8x128xf32>
    %191 = arith.subf %178, %190 : vector<8x128xf32>
    %cst_60 = arith.constant 9.99999974E-6 : f32
    %192 = vector.broadcast %cst_60 : f32 to vector<1x128xf32>
    %193 = arith.addf %189, %192 : vector<1x128xf32>
    %194 = math.rsqrt %193 : vector<1x128xf32>
    %195 = vector.broadcast %194 : vector<1x128xf32> to vector<8x128xf32>
    %196 = arith.mulf %191, %195 : vector<8x128xf32>
    %197 = vector.extract_strided_slice %8 {offsets = [0, 1], sizes = [8, 1], strides = [1, 1]} : vector<8x3xf32> to vector<8x1xf32>
    %198 = vector.broadcast %197 : vector<8x1xf32> to vector<8x128xf32>
    %199 = arith.mulf %196, %198 : vector<8x128xf32>
    %200 = vector.extract_strided_slice %8 {offsets = [0, 2], sizes = [8, 1], strides = [1, 1]} : vector<8x3xf32> to vector<8x1xf32>
    %201 = vector.broadcast %200 : vector<8x1xf32> to vector<8x128xf32>
    %202 = arith.addf %199, %201 : vector<8x128xf32>
    %cst_61 = arith.constant 5.000000e-01 : f32
    %203 = vector.broadcast %cst_61 : f32 to vector<8x128xf32>
    %204 = arith.mulf %203, %202 : vector<8x128xf32>
    %cst_62 = arith.constant 4.471500e-02 : f32
    %205 = vector.broadcast %cst_62 : f32 to vector<8x128xf32>
    %206 = arith.mulf %205, %202 : vector<8x128xf32>
    %207 = arith.mulf %206, %202 : vector<8x128xf32>
    %208 = arith.mulf %207, %202 : vector<8x128xf32>
    %209 = arith.addf %202, %208 : vector<8x128xf32>
    %cst_63 = arith.constant 0.797884583 : f32
    %210 = vector.broadcast %cst_63 : f32 to vector<8x128xf32>
    %211 = arith.mulf %210, %209 : vector<8x128xf32>
    %212 = math.tanh %211 : vector<8x128xf32>
    %cst_64 = arith.constant 1.000000e+00 : f32
    %213 = vector.broadcast %cst_64 : f32 to vector<8x128xf32>
    %214 = arith.addf %213, %212 : vector<8x128xf32>
    %215 = arith.mulf %204, %214 : vector<8x128xf32>
    %216 = vector.broadcast %9 : vector<8x1xf32> to vector<8x128xf32>
    %217 = arith.mulf %215, %216 : vector<8x128xf32>
    %cst_65 = arith.constant dense<0.000000e+00> : vector<128xf32>
    %218 = vector.multi_reduction <add>, %217, %cst_65 [0] : vector<8x128xf32> to vector<128xf32>
    %219 = vector.shape_cast %218 : vector<128xf32> to vector<1x128xf32>
    %220 = tpu.concatenate %173, %219 in 0 : vector<1x128xf32>, vector<1x128xf32> -> vector<2x128xf32>
    %221 = vector.broadcast %10 : vector<2x1xf32> to vector<2x128xf32>
    %222 = arith.addf %220, %221 : vector<2x128xf32>
    %c0_66 = arith.constant 0 : index
    %c0_67 = arith.constant 0 : index
    %223 = vector.load %arg14[%c0_66, %c0_67] : memref<2x128xf32, #tpu.memory_space<vmem>>, vector<2x128xf32>
    tpu.vector_store %arg14[%c0_66, %c0_67], %222 {strides = array<i32>} : memref<2x128xf32, #tpu.memory_space<vmem>>, vector<2x128xf32>,
    return
  }
  func.func @transform_0(%arg0: i32) -> (i32, i32) {
    %c0_i32 = arith.constant 0 : i32
    %c0_i32_0 = arith.constant 0 : i32
    return %c0_i32, %arg0 : i32, i32
  }
  func.func @transform_1(%arg0: i32) -> (i32, i32) {
    %c0_i32 = arith.constant 0 : i32
    %c0_i32_0 = arith.constant 0 : i32
    return %c0_i32, %arg0 : i32, i32
  }
  func.func @transform_2(%arg0: i32) -> (i32, i32) {
    %c0_i32 = arith.constant 0 : i32
    %c0_i32_0 = arith.constant 0 : i32
    %c0_i32_1 = arith.constant 0 : i32
    return %c0_i32, %c0_i32_0 : i32, i32
  }
  func.func @transform_3(%arg0: i32) -> (i32, i32) {
    %c0_i32 = arith.constant 0 : i32
    %c0_i32_0 = arith.constant 0 : i32
    %c0_i32_1 = arith.constant 0 : i32
    return %c0_i32, %c0_i32_0 : i32, i32
  }
  func.func @transform_4(%arg0: i32) -> (i32, i32) {
    %c0_i32 = arith.constant 0 : i32
    %c0_i32_0 = arith.constant 0 : i32
    %c0_i32_1 = arith.constant 0 : i32
    return %c0_i32, %c0_i32_0 : i32, i32
  }
  func.func @transform_5(%arg0: i32) -> (i32, i32) {
    %c0_i32 = arith.constant 0 : i32
    %c0_i32_0 = arith.constant 0 : i32
    %c0_i32_1 = arith.constant 0 : i32
    return %c0_i32, %c0_i32_0 : i32, i32
  }
  func.func @transform_6(%arg0: i32) -> (i32, i32) {
    %c0_i32 = arith.constant 0 : i32
    %c0_i32_0 = arith.constant 0 : i32
    %c0_i32_1 = arith.constant 0 : i32
    return %c0_i32, %c0_i32_0 : i32, i32
  }
  func.func @transform_7(%arg0: i32) -> (i32, i32) {
    %c0_i32 = arith.constant 0 : i32
    %c0_i32_0 = arith.constant 0 : i32
    %c0_i32_1 = arith.constant 0 : i32
    return %c0_i32, %c0_i32_0 : i32, i32
  }
  func.func @transform_8(%arg0: i32) -> (i32, i32) {
    %c0_i32 = arith.constant 0 : i32
    %c0_i32_0 = arith.constant 0 : i32
    %c0_i32_1 = arith.constant 0 : i32
    return %c0_i32, %c0_i32_0 : i32, i32
  }
  func.func @transform_9(%arg0: i32) -> (i32, i32) {
    %c0_i32 = arith.constant 0 : i32
    %c0_i32_0 = arith.constant 0 : i32
    %c0_i32_1 = arith.constant 0 : i32
    return %c0_i32, %c0_i32_0 : i32, i32
  }
  func.func @transform_10(%arg0: i32) -> (i32, i32) {
    %c0_i32 = arith.constant 0 : i32
    %c0_i32_0 = arith.constant 0 : i32
    %c0_i32_1 = arith.constant 0 : i32
    return %c0_i32, %c0_i32_0 : i32, i32
  }
  func.func @transform_11(%arg0: i32) -> (i32, i32) {
    %c0_i32 = arith.constant 0 : i32
    %c0_i32_0 = arith.constant 0 : i32
    %c0_i32_1 = arith.constant 0 : i32
    return %c0_i32, %c0_i32_0 : i32, i32
  }
  func.func @transform_12(%arg0: i32) -> (i32, i32) {
    %c0_i32 = arith.constant 0 : i32
    %c0_i32_0 = arith.constant 0 : i32
    %c0_i32_1 = arith.constant 0 : i32
    return %c0_i32, %c0_i32_0 : i32, i32
  }
  func.func @transform_13(%arg0: i32) -> (i32, i32) {
    %c0_i32 = arith.constant 0 : i32
    %c0_i32_0 = arith.constant 0 : i32
    return %c0_i32, %arg0 : i32, i32
  }
}

</mosaic_0001>

<bundles_post_ra>
// kernel: _lambda_.1
= control target key start
LH: loop header
LB: loop body
LE: loop exit
PB: predicated region body
PF: predicated region fallthrough
CT: control target
= control target key end

     0   :  { %v67_v0 = vlaneseq  ;;  %vm242_vm0 = vcmask 523264   ;;  %v881_v2 = vmov 0   ;;  %v882_v5 = vmov 0.0   ;;  %s1166_s0 = inlined_call_operand.vmem [shape: s32[5,128], index: 0, kind: input, shape index: {}]   ;;  %s1167_s2 = inlined_call_operand.vmem [shape: bf16[32,64], index: 2, kind: input, shape index: {}]   ;;  %s1168_s3 = inlined_call_operand.vmem [shape: f32[32,3], index: 3, kind: input, shape index: {}]   ;;  %s1169_s1 = inlined_call_operand.vmem [shape: f32[16,128], index: 1, kind: input, shape index: {}]   ;;  %s1170_s4 = inlined_call_operand.vmem [shape: bf16[16,32], index: 4, kind: input, shape index: {}]   ;;  %s1171_s5 = inlined_call_operand.vmem [shape: f32[16,3], index: 5, kind: input, shape index: {}]   ;;  %s1172_s10 = inlined_call_operand.vmem [shape: f32[8,3], index: 10, kind: input, shape index: {}]   ;;  %s1173_s7 = inlined_call_operand.vmem [shape: f32[8,3], index: 7, kind: input, shape index: {}]   ;;  %s1174_s8 = inlined_call_operand.vmem [shape: f32[8,1], index: 8, kind: input, shape index: {}]   ;;  %s1175_s11 = inlined_call_operand.vmem [shape: f32[8,1], index: 11, kind: input, shape index: {}]   ;;  %s1176_s12 = inlined_call_operand.vmem [shape: f32[2,1], index: 12, kind: input, shape index: {}]   ;;  %s1177_s6 = inlined_call_operand.vmem [shape: bf16[8,16], index: 6, kind: input, shape index: {}]   ;;  %s1178_s9 = inlined_call_operand.vmem [shape: bf16[8,16], index: 9, kind: input, shape index: {}]   ;;  %s1179_s13 = inlined_call_operand.vmem [shape: f32[2,128], index: 13, kind: output, shape index: {}]  }
   0x1   :  { %v64_v1 = vld [vmem:[%s1166_s0] sm:$0x1f]  ;;  %834 = vset.pattern.permute.xlu0 %v881_v2  ;;  %835 = vset.pattern.permute.xlu1 %v881_v2  ;;  %v974_v11 = vld [vmem:[%s1168_s3 + $0x10] sm:$0xff]  ;;  %v991_v19 = vld [vmem:[%s1168_s3 + $0x8] sm:$0xff]  ;;  %v883_v37 = vmov 1   ;;  %v884_v53 = vmov 2  }
   0x2   :  { %v68_v3 = vshrl.u32 %v67_v0, 7  ;;  %v854_v4 = vld [vmem:[%s1167_s2] sm:$0xff]   ;;  %809 = vmatprep.subr.bf16.mxu1 %v882_v5  ;;  %224 = vperm.xlu1 %835, %v974_v11   ;;  %v996_v20 = vld [vmem:[%s1168_s3 + $0x18] sm:$0xff] }
   0x3   :  { %805 = vmatprep.mubr.msk.bf16.mxu0 %vm242_vm0, %v854_v4  ;;  %v969_v10 = vld [vmem:[%s1168_s3] sm:$0xff] }
   0x4   :  { %v69_v6 = vadd.s32 8, %v68_v3  ;;  %v76_v7 = vsub.s32 0, %v68_v3  ;;  %v98_v8 = vsub.s32 1, %v68_v3  ;;  %v126_v9 = vsub.s32 2, %v68_v3  ;;  %214 = vperm.xlu0 %834, %v969_v10  }
   0x5   :  { %v154_v12 = vsub.s32 3, %v68_v3  ;;  %v182_v13 = vsub.s32 4, %v68_v3  ;;  %v976_v14 = vadd.s32 16, %v68_v3  ;;  %v986_v18 = vadd.s32 24, %v68_v3 }
   0x6   :  { %v980_v15 = vrot.slane %v64_v1, %v76_v7  ;;  %v982_v16 = vrot.slane %v64_v1, %v98_v8  ;;  %v984_v17 = vrot.slane %v64_v1, %v126_v9  ;;  %v1002_v23 = vadd.s32 32, %v68_v3  ;;  %229 = vperm.xlu1 %835, %v996_v20  }
   0x7   :  { %v998_v21 = vrot.slane %v64_v1, %v154_v12  ;;  %v1000_v22 = vrot.slane %v64_v1, %v182_v13  ;;  %v1004_v24 = vadd.s32 40, %v68_v3 }
   0x8   :  { %vm78_vm1 = vcmp.eq.s32.totalorder %v68_v3, %v980_v15  ;;  %vm79_vm2 = vcmp.eq.s32.totalorder %v69_v6, %v980_v15  ;;  %vm100_vm3 = vcmp.eq.s32.totalorder %v68_v3, %v982_v16  ;;  %vm101_vm4 = vcmp.eq.s32.totalorder %v69_v6, %v982_v16  ;;  %219 = vperm.xlu0 %834, %v991_v19  }
   0x9   :  { %v746_v25 = vsel %vm78_vm1, 1.0, %v882_v5  ;;  %v747_v26 = vsel %vm79_vm2, 1.0, %v882_v5  ;;  %v752_v27 = vsel %vm100_vm3, 1.0, %v882_v5  ;;  %v753_v28 = vsel %vm101_vm4, 1.0, %v882_v5 }
   0xa   :  { %v118_v29 = vadd.f32 %v752_v27, %v746_v25  ;;  %v119_v30 = vadd.f32 %v753_v28, %v747_v26  ;;  %vm128_vm5 = vcmp.eq.s32.totalorder %v68_v3, %v984_v17  ;;  %vm129_vm6 = vcmp.eq.s32.totalorder %v69_v6, %v984_v17  ;;  %837 = vset.pattern.permute.xlu1 %v883_v37  ;;  %v855_v26 = vld [vmem:[%s1167_s2 + $0x8] sm:$0xff]  }
   0xb   :  { %v758_v31 = vsel %vm128_vm5, 1.0, %v882_v5  ;;  %v759_v32 = vsel %vm129_vm6, 1.0, %v882_v5  ;;  %vm156_vm7 = vcmp.eq.s32.totalorder %v68_v3, %v998_v21  ;;  %vm157_vm8 = vcmp.eq.s32.totalorder %v69_v6, %v998_v21  ;;  %338 = vperm.xlu1 %837, %v991_v19   ;;  %v56_v27 = vld [vmem:[%s1171_s5 + $0x8] sm:$0xff] }
   0xc   :  { %v146_v33 = vadd.f32 %v758_v31, %v118_v29  ;;  %v147_v34 = vadd.f32 %v759_v32, %v119_v30  ;;  %v764_v35 = vsel %vm156_vm7, 1.0, %v882_v5  ;;  %v765_v36 = vsel %vm157_vm8, 1.0, %v882_v5  ;;  %836 = vset.pattern.permute.xlu0 %v883_v37 }
   0xd   :  { %vm184_vm9 = vcmp.eq.s32.totalorder %v68_v3, %v1000_v22  ;;  %vm185_vm10 = vcmp.eq.s32.totalorder %v69_v6, %v1000_v22  ;;  %vm80_vm11 = vcmp.eq.s32.totalorder %v976_v14, %v980_v15  ;;  %vm81_vm12 = vcmp.eq.s32.totalorder %v986_v18, %v980_v15  ;;  %334 = vperm.xlu0 %836, %v969_v10  }
   0xe   :  { %v174_v38 = vadd.f32 %v764_v35, %v146_v33  ;;  %v175_v39 = vadd.f32 %v765_v36, %v147_v34  ;;  %v770_v40 = vsel %vm184_vm9, 1.0, %v882_v5  ;;  %v771_v41 = vsel %vm185_vm10, 1.0, %v882_v5 }
   0xf   :  { %v748_v42 = vsel %vm80_vm11, 1.0, %v882_v5  ;;  %v749_v43 = vsel %vm81_vm12, 1.0, %v882_v5  ;;  %vm102_vm13 = vcmp.eq.s32.totalorder %v976_v14, %v982_v16  ;;  %vm103_vm14 = vcmp.eq.s32.totalorder %v986_v18, %v982_v16  ;;  %838 = vset.pattern.permute.xlu1 %v884_v53 }
  0x10   :  { %v202_v44 = vadd.f32 %v770_v40, %v174_v38  ;;  %v203_v45 = vadd.f32 %v771_v41, %v175_v39  ;;  %v754_v46 = vsel %vm102_vm13, 1.0, %v882_v5  ;;  %v755_v47 = vsel %vm103_vm14, 1.0, %v882_v5  ;;  %354 = vperm.xlu1 %838, %v969_v10  }
  0x11   :  { %v120_v48 = vadd.f32 %v754_v46, %v748_v42  ;;  %v121_v49 = vadd.f32 %v755_v47, %v749_v43  ;;  %vm130_vm15 = vcmp.eq.s32.totalorder %v976_v14, %v984_v17  ;;  %vm131_vm1 = vcmp.eq.s32.totalorder %v986_v18, %v984_v17  ;;  %839 = vset.pattern.permute.xlu0 %v884_v53 }
  0x12   :  { %v208_v50 = vpack.c.bf16 %v203_v45, %v202_v44  ;;  %v760_v51 = vsel %vm130_vm15, 1.0, %v882_v5  ;;  %v761_v52 = vsel %vm131_vm1, 1.0, %v882_v5  ;;  %vm158_vm2 = vcmp.eq.s32.totalorder %v976_v14, %v998_v21  ;;  %358 = vperm.xlu0 %839, %v991_v19  }
  0x13   :  { %v148_v54 = vadd.f32 %v760_v51, %v120_v48  ;;  %v149_v55 = vadd.f32 %v761_v52, %v121_v49  ;;  %vm159_vm3 = vcmp.eq.s32.totalorder %v986_v18, %v998_v21  ;;  %v766_v56 = vsel %vm158_vm2, 1.0, %v882_v5 }
  0x14   :  { %797 = vmatprep.subr.bf16.mxu0 %v208_v50  ;;  %v767_v57 = vsel %vm159_vm3, 1.0, %v882_v5  ;;  %vm186_vm4 = vcmp.eq.s32.totalorder %v976_v14, %v1000_v22  ;;  %vm187_vm5 = vcmp.eq.s32.totalorder %v986_v18, %v1000_v22  ;;  %vm82_vm6 = vcmp.eq.s32.totalorder %v1002_v23, %v980_v15  ;;  %840 = vset.pattern.permute.xlu1 %v883_v37 }
  0x15   :  { %798 = vmatpush3.bf16.msra.mxu0 %v208_v50  ;;  %v176_v58 = vadd.f32 %v766_v56, %v148_v54  ;;  %v177_v59 = vadd.f32 %v767_v57, %v149_v55  ;;  %v772_v60 = vsel %vm186_vm4, 1.0, %v882_v5  ;;  %v773_v61 = vsel %vm187_vm5, 1.0, %v882_v5  ;;  %342 = vperm.xlu1 %840, %v974_v11  }
  0x16   :  { %vm83_vm7 = vcmp.eq.s32.totalorder %v1004_v24, %v980_v15  ;;  %v750_v62 = vsel %vm82_vm6, 1.0, %v882_v5  ;;  %vm104_vm8 = vcmp.eq.s32.totalorder %v1002_v23, %v982_v16  ;;  %vm105_vm9 = vcmp.eq.s32.totalorder %v1004_v24, %v982_v16  ;;  %362 = vperm.xlu0 %839, %v974_v11  }
  0x17   :  { %v204_v63 = vadd.f32 %v772_v60, %v176_v58  ;;  %v205_v0 = vadd.f32 %v773_v61, %v177_v59  ;;  %v751_v1 = vsel %vm83_vm7, 1.0, %v882_v5  ;;  %v756_v3 = vsel %vm104_vm8, 1.0, %v882_v5 }
  0x18   :  { %v757_v4 = vsel %vm105_vm9, 1.0, %v882_v5  ;;  %v122_v6 = vadd.f32 %v756_v3, %v750_v62  ;;  %vm132_vm10 = vcmp.eq.s32.totalorder %v1002_v23, %v984_v17  ;;  %vm133_vm11 = vcmp.eq.s32.totalorder %v1004_v24, %v984_v17 }
  0x19   :  { %v209_v7 = vpack.c.bf16 %v205_v0, %v204_v63  ;;  %v123_v8 = vadd.f32 %v757_v4, %v751_v1  ;;  %v762_v9 = vsel %vm132_vm10, 1.0, %v882_v5  ;;  %v763_v10 = vsel %vm133_vm11, 1.0, %v882_v5  ;;  %346 = vperm.xlu1 %840, %v996_v20  }
  0x1a   :  { %v150_v12 = vadd.f32 %v762_v9, %v122_v6  ;;  %vm160_vm12 = vcmp.eq.s32.totalorder %v1002_v23, %v998_v21  ;;  %vm161_vm13 = vcmp.eq.s32.totalorder %v1004_v24, %v998_v21  ;;  %vm188_vm14 = vcmp.eq.s32.totalorder %v1002_v23, %v1000_v22  ;;  %842 = vset.pattern.permute.xlu0 %v881_v2  ;;  %v65_v21 = vld [vmem:[%s1169_s1] sm:$0xff] }
  0x1b   :  { %799 = vmatprep.subr.bf16.mxu0 %v209_v7  ;;  %v151_v13 = vadd.f32 %v763_v10, %v123_v8  ;;  %v768_v11 = vsel %vm160_vm12, 1.0, %v882_v5  ;;  %v769_v14 = vsel %vm161_vm13, 1.0, %v882_v5  ;;  %vm189_vm15 = vcmp.eq.s32.totalorder %v1004_v24, %v1000_v22  ;;  %v66_v22 = vld [vmem:[%s1169_s1 + $0x8] sm:$0xff] }
  0x1c   :  { %800 = vmatpush3.bf16.msra.mxu0 %v209_v7  ;;  %v178_v15 = vadd.f32 %v768_v11, %v150_v12  ;;  %v774_v16 = vsel %vm188_vm14, 1.0, %v882_v5  ;;  %v775_v17 = vsel %vm189_vm15, 1.0, %v882_v5  ;;  %v211_v25 = vpack.c.bf16 %v66_v22, %v65_v21 }
  0x1d   :  { %v179_v18 = vadd.f32 %v769_v14, %v151_v13  ;;  %841 = vset.pattern.permute.xlu1 %v884_v53  ;;  %vm885_vm1 = vmmov 0   ;;  %vm540_vm2 = vcmask 130048   ;;  %vm733_vm3 = vcmask 1040384  }
  0x1e   :  { %v206_v19 = vadd.f32 %v774_v16, %v178_v15  ;;  %366 = vperm.xlu1 %841, %v996_v20   ;;  %813 = vmatprep.mubr.msk.bf16.mxu1 %vm885_vm1, %v882_v5  ;;  %v55_v20 = vld [vmem:[%s1171_s5] sm:$0xff] }
  0x1f   :  { %v207_v23 = vadd.f32 %v775_v17, %v179_v18  ;;  %413 = vperm.xlu0 %842, %v55_v20  }
  0x21   :  { %v210_v24 = vpack.c.bf16 %v207_v23, %v206_v19 }
  0x22   :  { %843 = vset.pattern.permute.xlu1 %v881_v2 }
  0x23   :  { %801 = vmatprep.subr.bf16.mxu0 %v210_v24  ;;  %418 = vperm.xlu1 %843, %v56_v27  }
  0x24   :  { %802 = vmatpush3.bf16.msra.mxu0 %v210_v24  ;;  %845 = vset.pattern.permute.xlu0 %v883_v37 }
  0x25   :  { %803 = vmatprep.subr.bf16.mxu0 %v211_v25  ;;  %501 = vperm.xlu0 %845, %v56_v27  }
  0x27   :  { %844 = vset.pattern.permute.xlu1 %v883_v37 }
  0x28   :  { %804 = vmatpush3.bf16.msra.mxu0 %v211_v25  ;;  %497 = vperm.xlu1 %844, %v55_v20  }
  0x29   :  { %823 = vmatprep.subr.bf16.mxu0 %v882_v5  ;;  %847 = vset.pattern.permute.xlu0 %v881_v2 }
  0x2b   :  { %806 = vmatmul.mubr.msk.bf16.vlgmr.msra.gmra.mrb[0].mxu0 %vm242_vm0, %v855_v26  ;;  %vm426_vm0 = vcmask 261120  }
  0x2c   :  { %825 = vmatprep.mubr.msk.bf16.mxu0 %vm885_vm1, %v882_v5  ;;  %846 = vset.pattern.permute.xlu1 %v884_v53 }
  0x2d   :  { %507 = vperm.xlu1 %846, %v55_v20  }
  0x31   :  { %511 = vperm.xlu1 %846, %v56_v27  }
  0x35   :  { %848 = vset.pattern.permute.xlu1 %v881_v2 }
  0x81   :  { %v225_v29 = vpop.permute.xlu1 %224 }
  0x83   :  { %v215_v28 = vpop.permute.xlu0 %214 }
  0x85   :  { %v230_v38 = vpop.permute.xlu1 %229 }
  0x87   :  { %v220_v33 = vpop.permute.xlu0 %219 }
  0x8a   :  { %v339_v3 = vpop.permute.xlu1 %338 }
  0x8c   :  { %v335_v13 = vpop.permute.xlu0 %334 }
  0x8f   :  { %v355_v8 = vpop.permute.xlu1 %354 }
  0x91   :  { %v359_v14 = vpop.permute.xlu0 %358 }
  0x94   :  { %v343_v12 = vpop.permute.xlu1 %342 }
  0x95   :  { %v363_v22 = vpop.permute.xlu0 %362 }
  0x98   :  { %v347_v11 = vpop.permute.xlu1 %346 }
  0x9d   :  { %v367_v21 = vpop.permute.xlu1 %366 }
  0xfe   :  { %v807_v30 = vpop.f32.mrb[0].mxu0 }
  0xff   :  { %v283_v31 = vpop.f32.mrb[1].mxu0  ;;  %v292_v39 = vadd.f32 %v807_v30, %v225_v29 }
 0x100   :  { %v808_v32 = vpop.f32.mrb[2].mxu0  ;;  %v284_v35 = vadd.f32 %v283_v31, %v215_v28 }
 0x101   :  { %v286_v34 = vpop.f32.mrb[3].mxu0  ;;  %v295_v41 = vadd.f32 %v808_v32, %v230_v38 }
 0x102   :  { %v287_v36 = vadd.f32 %v286_v34, %v220_v33 }
 0x104   :  { %v298_v40 = vadd.f32 %v287_v36, %v284_v35 }
 0x106   :  { %v299_v42 = vadd.f32 %v298_v40, %v292_v39 }
 0x108   :  { %v300_v43 = vadd.f32 %v299_v42, %v295_v41 }
 0x10a   :  { %v301_v44 = vrot.slane %v300_v43, 4 }
 0x10c   :  { %v302_v45 = vadd.f32 %v301_v44, %v300_v43 }
 0x10e   :  { %v303_v46 = vrot.slane %v302_v45, 2 }
 0x110   :  { %v304_v47 = vadd.f32 %v303_v46, %v302_v45 }
 0x112   :  { %v305_v48 = vrot.slane %v304_v47, 1 }
 0x114   :  { %v306_v49 = vadd.f32 %v305_v48, %v304_v47 }
 0x116   :  { %v308_v50 = vmul.f32 0.03125, %v306_v49 }
 0x118   :  { %v309_v51 = vsub.f32 %v284_v35, %v308_v50  ;;  %v310_v52 = vsub.f32 %v287_v36, %v308_v50  ;;  %v311_v54 = vsub.f32 %v292_v39, %v308_v50  ;;  %v312_v55 = vsub.f32 %v295_v41, %v308_v50 }
 0x11a   :  { %v313_v56 = vmul.f32 %v309_v51, %v309_v51  ;;  %v314_v57 = vmul.f32 %v310_v52, %v310_v52  ;;  %v315_v58 = vmul.f32 %v311_v54, %v311_v54  ;;  %v316_v60 = vmul.f32 %v312_v55, %v312_v55 }
 0x11c   :  { %v317_v59 = vadd.f32 %v314_v57, %v313_v56 }
 0x11e   :  { %v318_v61 = vadd.f32 %v317_v59, %v315_v58 }
 0x120   :  { %v319_v62 = vadd.f32 %v318_v61, %v316_v60 }
 0x122   :  { %v320_v63 = vrot.slane %v319_v62, 4 }
 0x124   :  { %v321_v0 = vadd.f32 %v320_v63, %v319_v62 }
 0x126   :  { %v322_v1 = vrot.slane %v321_v0, 2 }
 0x128   :  { %v323_v4 = vadd.f32 %v322_v1, %v321_v0 }
 0x12a   :  { %v324_v6 = vrot.slane %v323_v4, 1 }
 0x12c   :  { %v325_v7 = vadd.f32 %v324_v6, %v323_v4 }
 0x12e   :  { %v326_v9 = vmul.f32 0.03125, %v325_v7 }
 0x130   :  { %v327_v10 = vadd.f32 1e-05, %v326_v9  ;;  %v61_v9 = vld [vmem:[%s1172_s10] sm:$0xff] }
 0x131   :  { %637 = vperm.xlu1 %848, %v61_v9  }
 0x132   :  { %857 = vrsqrt.f32 %v327_v10  ;;  %v58_v10 = vld [vmem:[%s1173_s7] sm:$0xff] }
 0x133   :  { %537 = vperm.xlu0 %847, %v58_v10  }
 0x135   :  { %849 = vset.pattern.permute.xlu1 %v883_v37 }
 0x136   :  { %605 = vperm.xlu1 %849, %v58_v10  }
 0x137   :  { %850 = vset.pattern.permute.xlu0 %v883_v37  ;;  %v63_v37 = vld [vmem:[%s1176_s12] sm:$0x3] }
 0x138   :  { %703 = vperm.xlu0 %850, %v61_v9  }
 0x13a   :  { %851 = vset.pattern.permute.xlu1 %v884_v53  ;;  %v419_v53 = vpop.permute.xlu1 %418 }
 0x13b   :  { %610 = vperm.xlu1 %851, %v58_v10   ;;  %v60_v10 = vld [vmem:[%s1178_s9] sm:$0xf] }
 0x13c   :  { %v858_v15 = vpop.eup %857  ;;  %852 = vset.pattern.permute.xlu0 %v881_v2 }
 0x13d   :  { %v330_v16 = vmul.f32 %v858_v15, %v310_v52  ;;  %v331_v17 = vmul.f32 %v858_v15, %v311_v54  ;;  %v329_v18 = vmul.f32 %v858_v15, %v309_v51  ;;  %v332_v19 = vmul.f32 %v858_v15, %v312_v55 }
 0x13f   :  { %v350_v23 = vmul.f32 %v339_v3, %v330_v16  ;;  %v351_v24 = vmul.f32 %v343_v12, %v331_v17  ;;  %v349_v25 = vmul.f32 %v335_v13, %v329_v18  ;;  %v352_v26 = vmul.f32 %v347_v11, %v332_v19  ;;  %708 = vperm.xlu1 %851, %v61_v9   ;;  %v62_v12 = vld [vmem:[%s1175_s11] sm:$0xff]  ;;  %v414_v13 = vpop.permute.xlu0 %413 }
 0x140   :  { %v57_v9 = vld [vmem:[%s1177_s6] sm:$0xf] }
 0x141   :  { %v369_v20 = vadd.f32 %v355_v8, %v349_v25  ;;  %v370_v27 = vadd.f32 %v359_v14, %v350_v23  ;;  %v372_v28 = vadd.f32 %v367_v21, %v352_v26  ;;  %v371_v29 = vadd.f32 %v363_v22, %v351_v24  ;;  %v856_v8 = vld [vmem:[%s1170_s4] sm:$0xff]  }
 0x143   :  { %v377_v30 = vmul.f32 0.044715, %v369_v20  ;;  %v378_v31 = vmul.f32 0.044715, %v370_v27  ;;  %v380_v32 = vmul.f32 0.044715, %v372_v28  ;;  %853 = vset.pattern.permute.xlu1 %v881_v2 }
 0x144   :  { %v379_v33 = vmul.f32 0.044715, %v371_v29  ;;  %v373_v54 = vmul.f32 0.5, %v369_v20  ;;  %v374_v57 = vmul.f32 0.5, %v370_v27  ;;  %v375_v61 = vmul.f32 0.5, %v371_v29  ;;  %723 = vperm.xlu1 %853, %v62_v12  }
 0x145   :  { %v382_v34 = vmul.f32 %v378_v31, %v370_v27  ;;  %v384_v35 = vmul.f32 %v380_v32, %v372_v28  ;;  %v381_v36 = vmul.f32 %v377_v30, %v369_v20  ;;  %v376_v0 = vmul.f32 0.5, %v372_v28 }
 0x146   :  { %v383_v38 = vmul.f32 %v379_v33, %v371_v29 }
 0x147   :  { %v388_v39 = vmul.f32 %v384_v35, %v372_v28  ;;  %v385_v40 = vmul.f32 %v381_v36, %v369_v20  ;;  %v386_v41 = vmul.f32 %v382_v34, %v370_v27 }
 0x148   :  { %v387_v42 = vmul.f32 %v383_v38, %v371_v29  ;;  %737 = vperm.xlu1 %853, %v63_v37  }
 0x149   :  { %v389_v43 = vadd.f32 %v385_v40, %v369_v20  ;;  %v390_v44 = vadd.f32 %v386_v41, %v370_v27  ;;  %v392_v45 = vadd.f32 %v388_v39, %v372_v28  ;;  %v498_v40 = vpop.permute.xlu1 %497 }
 0x14a   :  { %v391_v46 = vadd.f32 %v387_v42, %v371_v29 }
 0x14b   :  { %v393_v47 = vmul.f32 0.7978846, %v389_v43  ;;  %v394_v48 = vmul.f32 0.7978846, %v390_v44  ;;  %v396_v50 = vmul.f32 0.7978846, %v392_v45  ;;  %v502_v43 = vpop.permute.xlu0 %501 }
 0x14c   :  { %v395_v49 = vmul.f32 0.7978846, %v391_v46 }
 0x14d   :  { %859 = vtanh.f32 %v393_v47  ;;  %v508_v41 = vpop.permute.xlu1 %507 }
 0x14e   :  { %861 = vtanh.f32 %v394_v48 }
 0x14f   :  { %863 = vtanh.f32 %v395_v49 }
 0x150   :  { %865 = vtanh.f32 %v396_v50 }
 0x151   :  { %v512_v48 = vpop.permute.xlu1 %511 }
 0x157   :  { %v860_v51 = vpop.eup %859 }
 0x158   :  { %v862_v52 = vpop.eup %861  ;;  %v401_v55 = vadd.f32 1.0, %v860_v51 }
 0x159   :  { %v864_v56 = vpop.eup %863  ;;  %v402_v58 = vadd.f32 1.0, %v862_v52 }
 0x15a   :  { %v866_v59 = vpop.eup %865  ;;  %v405_v60 = vmul.f32 %v401_v55, %v373_v54  ;;  %v403_v62 = vadd.f32 1.0, %v864_v56 }
 0x15b   :  { %v406_v63 = vmul.f32 %v402_v58, %v374_v57  ;;  %v404_v1 = vadd.f32 1.0, %v866_v59 }
 0x15c   :  { %v407_v3 = vmul.f32 %v403_v62, %v375_v61 }
 0x15d   :  { %v409_v4 = vpack.c.bf16 %v406_v63, %v405_v60  ;;  %v408_v6 = vmul.f32 %v404_v1, %v376_v0 }
 0x15f   :  { %810 = vmatpush3.bf16.msra.mxu1 %v409_v4  ;;  %v410_v7 = vpack.c.bf16 %v408_v6, %v407_v3 }
 0x160   :  { %811 = vmatprep.subr.bf16.mxu1 %v882_v5 }
 0x163   :  { %812 = vmatpush3.bf16.msra.mxu1 %v410_v7 }
 0x164   :  { %817 = vmatprep.subr.bf16.mxu1 %v882_v5 }
 0x166   :  { %814 = vmatmul.mubr.msk.bf16.vlgmr.msra.gmra.mrb[0].mxu1 %vm426_vm0, %v856_v8 }
 0x167   :  { %819 = vmatprep.mubr.msk.bf16.mxu1 %vm885_vm1, %v882_v5  ;;  %v59_v5 = vld [vmem:[%s1174_s8] sm:$0xff] }
 0x168   :  { %625 = vperm.xlu0 %852, %v59_v5  }
 0x1b0   :  { %v638_v5 = vpop.permute.xlu1 %637 }
 0x1b2   :  { %v538_v12 = vpop.permute.xlu0 %537 }
 0x239   :  { %v464_v11 = vpop.f32.mrb[0].mxu1 }
 0x23a   :  { %v815_v14 = vpop.f32.mrb[1].mxu1  ;;  %v465_v16 = vadd.f32 %v464_v11, %v414_v13 }
 0x23b   :  { %v467_v15 = vpop.f32.mrb[2].mxu1 }
 0x23c   :  { %v468_v17 = vadd.f32 %v467_v15, %v419_v53  ;;  %v816_v18 = vpop.f32.mrb[3].mxu1 }
 0x23e   :  { %v471_v19 = vadd.f32 %v468_v17, %v465_v16 }
 0x240   :  { %v472_v21 = vrot.slane %v471_v19, 4 }
 0x242   :  { %v473_v22 = vadd.f32 %v472_v21, %v471_v19 }
 0x244   :  { %v474_v23 = vrot.slane %v473_v22, 2 }
 0x246   :  { %v475_v24 = vadd.f32 %v474_v23, %v473_v22 }
 0x248   :  { %v476_v2 = vrot.slane %v475_v24, 1 }
 0x24a   :  { %v477_v25 = vadd.f32 %v476_v2, %v475_v24 }
 0x24c   :  { %v479_v26 = vmul.f32 0.0625, %v477_v25 }
 0x24e   :  { %v481_v20 = vsub.f32 %v468_v17, %v479_v26  ;;  %v480_v27 = vsub.f32 %v465_v16, %v479_v26 }
 0x250   :  { %v483_v28 = vmul.f32 %v481_v20, %v481_v20  ;;  %v482_v29 = vmul.f32 %v480_v27, %v480_v27 }
 0x252   :  { %v484_v30 = vadd.f32 %v483_v28, %v482_v29 }
 0x254   :  { %v485_v31 = vrot.slane %v484_v30, 4 }
 0x256   :  { %v486_v32 = vadd.f32 %v485_v31, %v484_v30 }
 0x258   :  { %v487_v33 = vrot.slane %v486_v32, 2 }
 0x25a   :  { %v488_v34 = vadd.f32 %v487_v33, %v486_v32 }
 0x25c   :  { %v489_v35 = vrot.slane %v488_v34, 1 }
 0x25e   :  { %v490_v36 = vadd.f32 %v489_v35, %v488_v34 }
 0x260   :  { %v491_v38 = vmul.f32 0.0625, %v490_v36 }
 0x262   :  { %v492_v39 = vadd.f32 1e-05, %v491_v38 }
 0x264   :  { %867 = vrsqrt.f32 %v492_v39 }
 0x26e   :  { %v868_v42 = vpop.eup %867 }
 0x26f   :  { %v494_v44 = vmul.f32 %v868_v42, %v480_v27  ;;  %v495_v45 = vmul.f32 %v868_v42, %v481_v20 }
 0x271   :  { %v504_v46 = vmul.f32 %v498_v40, %v494_v44  ;;  %v505_v47 = vmul.f32 %v502_v43, %v495_v45 }
 0x273   :  { %v514_v49 = vadd.f32 %v508_v41, %v504_v46  ;;  %v515_v50 = vadd.f32 %v512_v48, %v505_v47 }
 0x275   :  { %v518_v51 = vmul.f32 0.044715, %v514_v49  ;;  %v519_v52 = vmul.f32 0.044715, %v515_v50  ;;  %v516_v0 = vmul.f32 0.5, %v514_v49  ;;  %v517_v3 = vmul.f32 0.5, %v515_v50 }
 0x277   :  { %v520_v54 = vmul.f32 %v518_v51, %v514_v49  ;;  %v521_v55 = vmul.f32 %v519_v52, %v515_v50 }
 0x279   :  { %v522_v56 = vmul.f32 %v520_v54, %v514_v49  ;;  %v523_v57 = vmul.f32 %v521_v55, %v515_v50  ;;  %v606_v55 = vpop.permute.xlu1 %605 }
 0x27b   :  { %v524_v58 = vadd.f32 %v522_v56, %v514_v49  ;;  %v525_v59 = vadd.f32 %v523_v57, %v515_v50 }
 0x27d   :  { %v526_v60 = vmul.f32 0.7978846, %v524_v58  ;;  %v527_v61 = vmul.f32 0.7978846, %v525_v59  ;;  %v611_v56 = vpop.permute.xlu1 %610 }
 0x27f   :  { %869 = vtanh.f32 %v526_v60  ;;  %v704_v60 = vpop.permute.xlu0 %703 }
 0x280   :  { %871 = vtanh.f32 %v527_v61 }
 0x289   :  { %v870_v62 = vpop.eup %869 }
 0x28a   :  { %v872_v63 = vpop.eup %871  ;;  %v530_v1 = vadd.f32 1.0, %v870_v62 }
 0x28b   :  { %v531_v4 = vadd.f32 1.0, %v872_v63 }
 0x28c   :  { %v532_v6 = vmul.f32 %v530_v1, %v516_v0  ;;  %v709_v1 = vpop.permute.xlu1 %708 }
 0x28d   :  { %v533_v7 = vmul.f32 %v531_v4, %v517_v3 }
 0x28f   :  { %v534_v8 = vpack.c.bf16 %v533_v7, %v532_v6 }
 0x291   :  { %818 = vmatpush3.bf16.msra.mxu1 %v534_v8  ;;  %824 = vmatpush3.bf16.msra.mxu0 %v534_v8 }
 0x294   :  { %820 = vmatmul.mubr.msk.bf16.vlgmr.msra.gmra.mrb[4].mxu1 %vm540_vm2, %v57_v9  ;;  %826 = vmatmul.mubr.msk.bf16.vlgmr.msra.gmra.mrb[4].mxu0 %vm540_vm2, %v60_v10 }
 0x367   :  { %v578_v37 = vpop.f32.mrb[4].mxu1  ;;  %v677_v13 = vpop.f32.mrb[4].mxu0 }
 0x368   :  { %v579_v11 = vadd.f32 %v578_v37, %v538_v12  ;;  %v678_v53 = vadd.f32 %v677_v13, %v638_v5  ;;  %v821_v14 = vpop.f32.mrb[5].mxu1  ;;  %v827_v15 = vpop.f32.mrb[5].mxu0 }
 0x369   :  { %v581_v16 = vpop.f32.mrb[6].mxu1  ;;  %v680_v17 = vpop.f32.mrb[6].mxu0 }
 0x36a   :  { %v584_v18 = vrot.slane %v579_v11, 4  ;;  %v683_v19 = vrot.slane %v678_v53, 4  ;;  %v822_v21 = vpop.f32.mrb[7].mxu1  ;;  %v828_v22 = vpop.f32.mrb[7].mxu0 }
 0x36b   :  { %v724_v22 = vpop.permute.xlu1 %723 }
 0x36c   :  { %v585_v23 = vadd.f32 %v584_v18, %v579_v11  ;;  %v684_v24 = vadd.f32 %v683_v19, %v678_v53  ;;  %v626_v18 = vpop.permute.xlu0 %625 }
 0x36e   :  { %v586_v2 = vrot.slane %v585_v23, 2  ;;  %v685_v25 = vrot.slane %v684_v24, 2 }
 0x370   :  { %v587_v26 = vadd.f32 %v586_v2, %v585_v23  ;;  %v686_v20 = vadd.f32 %v685_v25, %v684_v24 }
 0x372   :  { %v588_v27 = vrot.slane %v587_v26, 1  ;;  %v687_v28 = vrot.slane %v686_v20, 1 }
 0x374   :  { %v589_v29 = vadd.f32 %v588_v27, %v587_v26  ;;  %v688_v30 = vadd.f32 %v687_v28, %v686_v20 }
 0x376   :  { %v591_v31 = vmul.f32 0.125, %v589_v29  ;;  %v689_v32 = vmul.f32 0.125, %v688_v30 }
 0x378   :  { %v592_v33 = vsub.f32 %v579_v11, %v591_v31  ;;  %v690_v34 = vsub.f32 %v678_v53, %v689_v32 }
 0x37a   :  { %v593_v35 = vmul.f32 %v592_v33, %v592_v33  ;;  %v691_v36 = vmul.f32 %v690_v34, %v690_v34 }
 0x37c   :  { %v594_v38 = vrot.slane %v593_v35, 4  ;;  %v692_v39 = vrot.slane %v691_v36, 4 }
 0x37e   :  { %v595_v40 = vadd.f32 %v594_v38, %v593_v35  ;;  %v693_v41 = vadd.f32 %v692_v39, %v691_v36  ;;  %v738_v35 = vpop.permute.xlu1 %737 }
 0x380   :  { %v596_v42 = vrot.slane %v595_v40, 2  ;;  %v694_v43 = vrot.slane %v693_v41, 2 }
 0x382   :  { %v597_v44 = vadd.f32 %v596_v42, %v595_v40  ;;  %v695_v45 = vadd.f32 %v694_v43, %v693_v41 }
 0x384   :  { %v598_v46 = vrot.slane %v597_v44, 1  ;;  %v696_v47 = vrot.slane %v695_v45, 1 }
 0x386   :  { %v599_v48 = vadd.f32 %v598_v46, %v597_v44  ;;  %v697_v49 = vadd.f32 %v696_v47, %v695_v45 }
 0x388   :  { %v600_v50 = vmul.f32 0.125, %v599_v48  ;;  %v698_v51 = vmul.f32 0.125, %v697_v49 }
 0x38a   :  { %v601_v52 = vadd.f32 1e-05, %v600_v50  ;;  %v699_v54 = vadd.f32 1e-05, %v698_v51 }
 0x38c   :  { %873 = vrsqrt.f32 %v601_v52 }
 0x38d   :  { %875 = vrsqrt.f32 %v699_v54 }
 0x396   :  { %v874_v57 = vpop.eup %873 }
 0x397   :  { %v876_v58 = vpop.eup %875  ;;  %v603_v59 = vmul.f32 %v874_v57, %v592_v33 }
 0x398   :  { %v701_v61 = vmul.f32 %v876_v58, %v690_v34 }
 0x399   :  { %v608_v62 = vmul.f32 %v606_v55, %v603_v59 }
 0x39a   :  { %v706_v63 = vmul.f32 %v704_v60, %v701_v61 }
 0x39b   :  { %v613_v0 = vadd.f32 %v611_v56, %v608_v62 }
 0x39c   :  { %v711_v3 = vadd.f32 %v709_v1, %v706_v63 }
 0x39d   :  { %v615_v4 = vmul.f32 0.044715, %v613_v0  ;;  %v614_v14 = vmul.f32 0.5, %v613_v0 }
 0x39e   :  { %v713_v6 = vmul.f32 0.044715, %v711_v3  ;;  %v712_v16 = vmul.f32 0.5, %v711_v3 }
 0x39f   :  { %v616_v7 = vmul.f32 %v615_v4, %v613_v0 }
 0x3a0   :  { %v714_v8 = vmul.f32 %v713_v6, %v711_v3 }
 0x3a1   :  { %v617_v9 = vmul.f32 %v616_v7, %v613_v0 }
 0x3a2   :  { %v715_v10 = vmul.f32 %v714_v8, %v711_v3 }
 0x3a3   :  { %v618_v5 = vadd.f32 %v617_v9, %v613_v0 }
 0x3a4   :  { %v716_v12 = vadd.f32 %v715_v10, %v711_v3 }
 0x3a5   :  { %v619_v37 = vmul.f32 0.7978846, %v618_v5 }
 0x3a6   :  { %v717_v13 = vmul.f32 0.7978846, %v716_v12 }
 0x3a7   :  { %877 = vtanh.f32 %v619_v37 }
 0x3a8   :  { %879 = vtanh.f32 %v717_v13 }
 0x3b1   :  { %v878_v11 = vpop.eup %877 }
 0x3b2   :  { %v880_v53 = vpop.eup %879  ;;  %v621_v15 = vadd.f32 1.0, %v878_v11 }
 0x3b3   :  { %v719_v17 = vadd.f32 1.0, %v880_v53 }
 0x3b4   :  { %v622_v19 = vmul.f32 %v621_v15, %v614_v14 }
 0x3b5   :  { %v720_v21 = vmul.f32 %v719_v17, %v712_v16 }
 0x3b6   :  { %v628_v23 = vmul.f32 %v626_v18, %v622_v19 }
 0x3b7   :  { %v726_v24 = vmul.f32 %v724_v22, %v720_v21 }
 0x3b8   :  { %v629_v2 = vrot.slane %v628_v23, 4 }
 0x3b9   :  { %v727_v25 = vrot.slane %v726_v24, 4 }
 0x3ba   :  { %v630_v26 = vadd.f32 %v629_v2, %v628_v23 }
 0x3bb   :  { %v728_v20 = vadd.f32 %v727_v25, %v726_v24 }
 0x3bc   :  { %v631_v27 = vrot.slane %v630_v26, 2 }
 0x3bd   :  { %v729_v28 = vrot.slane %v728_v20, 2 }
 0x3be   :  { %v632_v29 = vadd.f32 %v631_v27, %v630_v26 }
 0x3bf   :  { %v730_v30 = vadd.f32 %v729_v28, %v728_v20 }
 0x3c0   :  { %v633_v31 = vrot.slane %v632_v29, 1 }
 0x3c1   :  { %v731_v32 = vrot.slane %v730_v30, 1 }
 0x3c2   :  { %v634_v33 = vadd.f32 %v633_v31, %v632_v29 }
 0x3c3   :  { %v732_v34 = vadd.f32 %v731_v32, %v730_v30 }
 0x3c5   :  { %v734_v36 = vsel %vm733_vm3, %v634_v33, %v732_v34 }
 0x3c6   :  { %v740_v38 = vadd.f32 %v738_v35, %v734_v36 }
 0x3c8   :  { %741 = vst [vmem:[%s1179_s13] sm:$0x3] %v740_v38 }

</bundles_post_ra>
